<compile_context>
chip_gen: v7x
topology: tpu7x:2x2x1
jax: 0.10.0
libtpu: 0.0.40
codegen_flags: <defaults>
</compile_context>

<pallas_src>
import functools

import jax
import jax.numpy as jnp
from jax.experimental import pallas as pl
from jax.experimental.pallas import tpu as pltpu


def _round_up(x, m):
    return (x + m - 1) // m * m


def _l1_spectral_kernel(true_ref, pred_ref, l1_ref, cos_ref,
                        dot_acc, pn2_acc, tn2_acc):
    """One (TB, TK) tile: accumulate per-row L1 / dot / norm^2 over the k axis."""
    k = pl.program_id(1)
    nk = pl.num_programs(1)

    @pl.when(k == 0)
    def _():
        l1_ref[...] = jnp.zeros_like(l1_ref)
        dot_acc[...] = jnp.zeros_like(dot_acc)
        pn2_acc[...] = jnp.zeros_like(pn2_acc)
        tn2_acc[...] = jnp.zeros_like(tn2_acc)

    t = true_ref[...].astype(jnp.float32)              # (TB, TK)
    p = pred_ref[...].astype(jnp.float32)              # (TB, TK)

    mask = (t >= 0.0).astype(jnp.float32)              # computed once per tile
    pm = p * mask                                      # masked pred
    tm = t * mask                                      # masked true

    # Four per-row reductions share the masked products (single VPU pass).
    l1_ref[...] += jnp.sum(jnp.abs(pm), axis=-1, keepdims=True)
    dot_acc[...] += jnp.sum(pm * tm, axis=-1, keepdims=True)
    pn2_acc[...] += jnp.sum(pm * pm, axis=-1, keepdims=True)
    tn2_acc[...] += jnp.sum(tm * tm, axis=-1, keepdims=True)

    @pl.when(k == nk - 1)
    def _():
        # F.normalize semantics: x / max(||x||, 1e-12); then clamp cosine to [-1, 1].
        pn = jnp.maximum(jnp.sqrt(pn2_acc[...]), 1e-12)
        tn = jnp.maximum(jnp.sqrt(tn2_acc[...]), 1e-12)
        # NOTE: clamping to exactly +/-1 matches the torch forward; if a
        # backward pass is ever added, clip slightly inside to avoid inf grads.
        cos_ref[...] = jnp.clip(dot_acc[...] / (pn * tn), -1.0, 1.0)


def _pick_tiles(B, D):
    """Row tile (mult of 8, <=256) and k tile (mult of 128, <=2048), low padding waste."""
    b8 = _round_up(B, 8)
    ni = pl.cdiv(b8, 256)
    tb = _round_up(pl.cdiv(b8, ni), 8)

    d128 = _round_up(D, 128)
    nk = pl.cdiv(d128, 2048)
    tk = _round_up(pl.cdiv(d128, nk), 128)
    return tb, tk


def _l1_spectral_stats(true, pred):
    """Per-row L1 of masked pred and clamped masked-cosine, via one Pallas pass."""
    B, D = true.shape
    tb, tk = _pick_tiles(B, D)
    Bp, Dp = _round_up(B, tb), _round_up(D, tk)

    if (Bp, Dp) != (B, D):
        # Pad `true` with -1 so padded entries are masked out (zero contribution).
        true = jnp.pad(true, ((0, Bp - B), (0, Dp - D)), constant_values=-1.0)
        pred = jnp.pad(pred, ((0, Bp - B), (0, Dp - D)))

    grid = (Bp // tb, Dp // tk)

    l1, cos = pl.pallas_call(
        _l1_spectral_kernel,
        out_shape=(jax.ShapeDtypeStruct((Bp, 1), jnp.float32),
                   jax.ShapeDtypeStruct((Bp, 1), jnp.float32)),
        grid_spec=pltpu.PrefetchScalarGridSpec(
            num_scalar_prefetch=0,
            grid=grid,                                      # (rows, reduction) — k last
            in_specs=[pl.BlockSpec((tb, tk), lambda i, k: (i, k)),
                      pl.BlockSpec((tb, tk), lambda i, k: (i, k))],
            out_specs=[pl.BlockSpec((tb, 1), lambda i, k: (i, 0)),   # resident over k
                       pl.BlockSpec((tb, 1), lambda i, k: (i, 0))],
            scratch_shapes=[pltpu.VMEM((tb, 1), jnp.float32)] * 3),
        compiler_params=pltpu.CompilerParams(
            dimension_semantics=("parallel", "arbitrary"),
            vmem_limit_bytes=32 * 1024 * 1024),
    )(true, pred)

    return l1[:B, 0], cos[:B, 0]


@functools.partial(jax.jit, static_argnames=("lambdaa", "loss_fn"))
def l1_loss_forward(true, pred, *, lambdaa=0.001, loss_fn=None):
    """Matches L1Loss(loss_fn, lambdaa).forward(true, pred) -> (loss, base, l1_v)."""
    l1_row, cos_row = _l1_spectral_stats(true, pred)
    l1_v = jnp.mean(l1_row)

    if loss_fn is None:
        # pept3's canonical loss_fn = spectral_distance, fused into the kernel.
        base = jnp.mean((2.0 / jnp.pi) * jnp.arccos(cos_row))
    else:
        # TODO(synk): arbitrary torch loss_fn callables have no Pallas equivalent;
        # a user-supplied JAX callable receives (true, masked pred) like the module.
        pred_masked = pred * (true >= 0).astype(pred.dtype)
        base = loss_fn(true, pred_masked)

    loss = base + lambdaa * l1_v
    return loss, base, l1_v


def _reference(true, pred, lambdaa):
    """Plain-JAX reference of L1Loss(spectral_distance, lambdaa).forward."""
    mask = (true >= 0).astype(jnp.float32)
    pm = pred * mask
    tm = true * mask
    l1_v = jnp.abs(pm).sum(1).mean()
    pn = jnp.maximum(jnp.linalg.norm(pm, axis=1, keepdims=True), 1e-12)
    tn = jnp.maximum(jnp.linalg.norm(tm, axis=1, keepdims=True), 1e-12)
    cos = jnp.clip(jnp.sum((pm / pn) * (tm / tn), axis=1), -1.0, 1.0)
    base = jnp.mean((2.0 / jnp.pi) * jnp.arccos(cos))
    return base + lambdaa * l1_v, base, l1_v


if __name__ == "__main__":
    # L1Loss has no learned parameters (loss_fn / lambdaa are hyperparameters).
    # Spectra-like demo shape: batch=8, 174 fragment intensities (29 x 2 ions x 3 charges);
    # D is deliberately not a multiple of 128 to exercise the padding path.
    B, D = 8, 174
    key = jax.random.PRNGKey(0)
    k1, k2 = jax.random.split(key)
    true = jax.random.normal(k1, (B, D), dtype=jnp.float32)   # negatives => masked out
    pred = jax.random.normal(k2, (B, D), dtype=jnp.float32)

    loss, base, l1_v = l1_loss_forward(true, pred, lambdaa=0.001)
    loss = jax.block_until_ready(loss)

    ref_loss, ref_base, ref_l1 = _reference(true, pred, 0.001)
    assert jnp.isfinite(loss), "loss is not finite"
    assert jnp.allclose(loss, ref_loss, rtol=1e-5, atol=1e-5), (loss, ref_loss)
    assert jnp.allclose(base, ref_base, rtol=1e-5, atol=1e-5), (base, ref_base)
    assert jnp.allclose(l1_v, ref_l1, rtol=1e-5, atol=1e-5), (l1_v, ref_l1)
    print("KERNEL_OK")
</pallas_src>

<mosaic_0001>
module attributes {stable_mosaic.version = 11 : i64} {
  func.func @_l1_spectral_kernel(%arg0: i32, %arg1: i32, %arg2: memref<8x256xf32, #tpu.memory_space<vmem>>, %arg3: memref<8x256xf32, #tpu.memory_space<vmem>>, %arg4: memref<8x1xf32, #tpu.memory_space<vmem>>, %arg5: memref<8x1xf32, #tpu.memory_space<vmem>>, %arg6: memref<8x1xf32, #tpu.memory_space<vmem>>, %arg7: memref<8x1xf32, #tpu.memory_space<vmem>>, %arg8: memref<8x1xf32, #tpu.memory_space<vmem>>) attributes {dimension_semantics = [#tpu.dimension_semantics<parallel>, #tpu.dimension_semantics<arbitrary>], iteration_bounds = array<i64: 1, 1>, scalar_prefetch = 0 : i64, scratch_operands = 3 : i64, tpu.core_type = #tpu.core_type<tc>, window_params = [{transform_indices = @transform_0, window_bounds = array<i64: 8, 256>}, {transform_indices = @transform_1, window_bounds = array<i64: 8, 256>}, {transform_indices = @transform_2, window_bounds = array<i64: 8, 1>}, {transform_indices = @transform_3, window_bounds = array<i64: 8, 1>}]} {
    %c0_i32 = arith.constant 0 : i32
    %0 = arith.cmpi eq, %arg1, %c0_i32 : i32
    %1 = arith.extui %0 : i1 to i32
    %c0_i32_0 = arith.constant 0 : i32
    %2 = arith.cmpi ne, %1, %c0_i32_0 : i32
    scf.if %2 {
      %cst_26 = arith.constant 0.000000e+00 : f32
      %38 = vector.broadcast %cst_26 : f32 to vector<8x1xf32>
      %c0_27 = arith.constant 0 : index
      %c0_28 = arith.constant 0 : index
      %39 = vector.load %arg4[%c0_27, %c0_28] : memref<8x1xf32, #tpu.memory_space<vmem>>, vector<8x1xf32>
      tpu.vector_store %arg4[%c0_27, %c0_28], %38 {strides = array<i32>} : memref<8x1xf32, #tpu.memory_space<vmem>>, vector<8x1xf32>,
      %cst_29 = arith.constant 0.000000e+00 : f32
      %40 = vector.broadcast %cst_29 : f32 to vector<8x1xf32>
      %c0_30 = arith.constant 0 : index
      %c0_31 = arith.constant 0 : index
      %41 = vector.load %arg6[%c0_30, %c0_31] : memref<8x1xf32, #tpu.memory_space<vmem>>, vector<8x1xf32>
      tpu.vector_store %arg6[%c0_30, %c0_31], %40 {strides = array<i32>} : memref<8x1xf32, #tpu.memory_space<vmem>>, vector<8x1xf32>,
      %cst_32 = arith.constant 0.000000e+00 : f32
      %42 = vector.broadcast %cst_32 : f32 to vector<8x1xf32>
      %c0_33 = arith.constant 0 : index
      %c0_34 = arith.constant 0 : index
      %43 = vector.load %arg7[%c0_33, %c0_34] : memref<8x1xf32, #tpu.memory_space<vmem>>, vector<8x1xf32>
      tpu.vector_store %arg7[%c0_33, %c0_34], %42 {strides = array<i32>} : memref<8x1xf32, #tpu.memory_space<vmem>>, vector<8x1xf32>,
      %cst_35 = arith.constant 0.000000e+00 : f32
      %44 = vector.broadcast %cst_35 : f32 to vector<8x1xf32>
      %c0_36 = arith.constant 0 : index
      %c0_37 = arith.constant 0 : index
      %45 = vector.load %arg8[%c0_36, %c0_37] : memref<8x1xf32, #tpu.memory_space<vmem>>, vector<8x1xf32>
      tpu.vector_store %arg8[%c0_36, %c0_37], %44 {strides = array<i32>} : memref<8x1xf32, #tpu.memory_space<vmem>>, vector<8x1xf32>,
    } else {
    }
    %c0 = arith.constant 0 : index
    %c0_1 = arith.constant 0 : index
    %3 = vector.load %arg2[%c0, %c0_1] : memref<8x256xf32, #tpu.memory_space<vmem>>, vector<8x256xf32>
    %c0_2 = arith.constant 0 : index
    %c0_3 = arith.constant 0 : index
    %4 = vector.load %arg3[%c0_2, %c0_3] : memref<8x256xf32, #tpu.memory_space<vmem>>, vector<8x256xf32>
    %cst = arith.constant 0.000000e+00 : f32
    %5 = vector.broadcast %cst : f32 to vector<8x256xf32>
    %6 = arith.cmpf oge, %3, %5 : vector<8x256xf32>
    %7 = arith.extui %6 : vector<8x256xi1> to vector<8x256xi32>
    %8 = arith.sitofp %7 : vector<8x256xi32> to vector<8x256xf32>
    %9 = arith.mulf %4, %8 : vector<8x256xf32>
    %10 = arith.mulf %3, %8 : vector<8x256xf32>
    %c0_4 = arith.constant 0 : index
    %c0_5 = arith.constant 0 : index
    %11 = vector.load %arg4[%c0_4, %c0_5] : memref<8x1xf32, #tpu.memory_space<vmem>>, vector<8x1xf32>
    %12 = math.absf %9 : vector<8x256xf32>
    %cst_6 = arith.constant dense<0.000000e+00> : vector<8xf32>
    %13 = vector.multi_reduction <add>, %12, %cst_6 [1] : vector<8x256xf32> to vector<8xf32>
    %14 = vector.shape_cast %13 : vector<8xf32> to vector<8x1xf32>
    %15 = arith.addf %11, %14 : vector<8x1xf32>
    %c0_7 = arith.constant 0 : index
    %c0_8 = arith.constant 0 : index
    %16 = vector.load %arg4[%c0_7, %c0_8] : memref<8x1xf32, #tpu.memory_space<vmem>>, vector<8x1xf32>
    tpu.vector_store %arg4[%c0_7, %c0_8], %15 {strides = array<i32>} : memref<8x1xf32, #tpu.memory_space<vmem>>, vector<8x1xf32>,
    %c0_9 = arith.constant 0 : index
    %c0_10 = arith.constant 0 : index
    %17 = vector.load %arg6[%c0_9, %c0_10] : memref<8x1xf32, #tpu.memory_space<vmem>>, vector<8x1xf32>
    %18 = arith.mulf %9, %10 : vector<8x256xf32>
    %cst_11 = arith.constant dense<0.000000e+00> : vector<8xf32>
    %19 = vector.multi_reduction <add>, %18, %cst_11 [1] : vector<8x256xf32> to vector<8xf32>
    %20 = vector.shape_cast %19 : vector<8xf32> to vector<8x1xf32>
    %21 = arith.addf %17, %20 : vector<8x1xf32>
    %c0_12 = arith.constant 0 : index
    %c0_13 = arith.constant 0 : index
    %22 = vector.load %arg6[%c0_12, %c0_13] : memref<8x1xf32, #tpu.memory_space<vmem>>, vector<8x1xf32>
    tpu.vector_store %arg6[%c0_12, %c0_13], %21 {strides = array<i32>} : memref<8x1xf32, #tpu.memory_space<vmem>>, vector<8x1xf32>,
    %c0_14 = arith.constant 0 : index
    %c0_15 = arith.constant 0 : index
    %23 = vector.load %arg7[%c0_14, %c0_15] : memref<8x1xf32, #tpu.memory_space<vmem>>, vector<8x1xf32>
    %24 = arith.mulf %9, %9 : vector<8x256xf32>
    %cst_16 = arith.constant dense<0.000000e+00> : vector<8xf32>
    %25 = vector.multi_reduction <add>, %24, %cst_16 [1] : vector<8x256xf32> to vector<8xf32>
    %26 = vector.shape_cast %25 : vector<8xf32> to vector<8x1xf32>
    %27 = arith.addf %23, %26 : vector<8x1xf32>
    %c0_17 = arith.constant 0 : index
    %c0_18 = arith.constant 0 : index
    %28 = vector.load %arg7[%c0_17, %c0_18] : memref<8x1xf32, #tpu.memory_space<vmem>>, vector<8x1xf32>
    tpu.vector_store %arg7[%c0_17, %c0_18], %27 {strides = array<i32>} : memref<8x1xf32, #tpu.memory_space<vmem>>, vector<8x1xf32>,
    %c0_19 = arith.constant 0 : index
    %c0_20 = arith.constant 0 : index
    %29 = vector.load %arg8[%c0_19, %c0_20] : memref<8x1xf32, #tpu.memory_space<vmem>>, vector<8x1xf32>
    %30 = arith.mulf %10, %10 : vector<8x256xf32>
    %cst_21 = arith.constant dense<0.000000e+00> : vector<8xf32>
    %31 = vector.multi_reduction <add>, %30, %cst_21 [1] : vector<8x256xf32> to vector<8xf32>
    %32 = vector.shape_cast %31 : vector<8xf32> to vector<8x1xf32>
    %33 = arith.addf %29, %32 : vector<8x1xf32>
    %c0_22 = arith.constant 0 : index
    %c0_23 = arith.constant 0 : index
    %34 = vector.load %arg8[%c0_22, %c0_23] : memref<8x1xf32, #tpu.memory_space<vmem>>, vector<8x1xf32>
    tpu.vector_store %arg8[%c0_22, %c0_23], %33 {strides = array<i32>} : memref<8x1xf32, #tpu.memory_space<vmem>>, vector<8x1xf32>,
    %c0_i32_24 = arith.constant 0 : i32
    %35 = arith.cmpi eq, %arg1, %c0_i32_24 : i32
    %36 = arith.extui %35 : i1 to i32
    %c0_i32_25 = arith.constant 0 : i32
    %37 = arith.cmpi ne, %36, %c0_i32_25 : i32
    scf.if %37 {
      %c0_26 = arith.constant 0 : index
      %c0_27 = arith.constant 0 : index
      %38 = vector.load %arg7[%c0_26, %c0_27] : memref<8x1xf32, #tpu.memory_space<vmem>>, vector<8x1xf32>
      %39 = math.sqrt %38 : vector<8x1xf32>
      %cst_28 = arith.constant 9.99999996E-13 : f32
      %40 = vector.broadcast %cst_28 : f32 to vector<8x1xf32>
      %41 = arith.maximumf %39, %40 : vector<8x1xf32>
      %c0_29 = arith.constant 0 : index
      %c0_30 = arith.constant 0 : index
      %42 = vector.load %arg8[%c0_29, %c0_30] : memref<8x1xf32, #tpu.memory_space<vmem>>, vector<8x1xf32>
      %43 = math.sqrt %42 : vector<8x1xf32>
      %cst_31 = arith.constant 9.99999996E-13 : f32
      %44 = vector.broadcast %cst_31 : f32 to vector<8x1xf32>
      %45 = arith.maximumf %43, %44 : vector<8x1xf32>
      %c0_32 = arith.constant 0 : index
      %c0_33 = arith.constant 0 : index
      %46 = vector.load %arg6[%c0_32, %c0_33] : memref<8x1xf32, #tpu.memory_space<vmem>>, vector<8x1xf32>
      %47 = arith.mulf %41, %45 : vector<8x1xf32>
      %48 = arith.divf %46, %47 : vector<8x1xf32>
      %cst_34 = arith.constant -1.000000e+00 : f32
      %cst_35 = arith.constant 1.000000e+00 : f32
      %49 = vector.broadcast %cst_34 : f32 to vector<8x1xf32>
      %50 = arith.maximumf %49, %48 : vector<8x1xf32>
      %51 = vector.broadcast %cst_35 : f32 to vector<8x1xf32>
      %52 = arith.minimumf %51, %50 : vector<8x1xf32>
      %c0_36 = arith.constant 0 : index
      %c0_37 = arith.constant 0 : index
      %53 = vector.load %arg5[%c0_36, %c0_37] : memref<8x1xf32, #tpu.memory_space<vmem>>, vector<8x1xf32>
      tpu.vector_store %arg5[%c0_36, %c0_37], %52 {strides = array<i32>} : memref<8x1xf32, #tpu.memory_space<vmem>>, vector<8x1xf32>,
    } else {
    }
    return
  }
  func.func @transform_0(%arg0: i32, %arg1: i32) -> (i32, i32) {
    %c0_i32 = arith.constant 0 : i32
    return %arg0, %arg1 : i32, i32
  }
  func.func @transform_1(%arg0: i32, %arg1: i32) -> (i32, i32) {
    %c0_i32 = arith.constant 0 : i32
    return %arg0, %arg1 : i32, i32
  }
  func.func @transform_2(%arg0: i32, %arg1: i32) -> (i32, i32) {
    %c0_i32 = arith.constant 0 : i32
    %c0_i32_0 = arith.constant 0 : i32
    return %arg0, %c0_i32 : i32, i32
  }
  func.func @transform_3(%arg0: i32, %arg1: i32) -> (i32, i32) {
    %c0_i32 = arith.constant 0 : i32
    %c0_i32_0 = arith.constant 0 : i32
    return %arg0, %c0_i32 : i32, i32
  }
}

</mosaic_0001>

<bundles_post_ra>
// kernel: l1_loss_forward.1
= control target key start
LH: loop header
LB: loop body
LE: loop exit
PB: predicated region body
PF: predicated region fallthrough
CT: control target
= control target key end

     0   :  { %vm17_vm0 = vcmask 7168   ;;  %v115_v3 = vmov 0.0   ;;  %s169_s0 = inlined_call_operand.vmem [shape: f32[8,256], index: 0, kind: input, shape index: {}]   ;;  %s170_s1 = inlined_call_operand.vmem [shape: f32[8,256], index: 1, kind: input, shape index: {}]   ;;  %s171_s2 = inlined_call_operand.vmem [shape: f32[8,1], index: 2, kind: output, shape index: {0}]   ;;  %s172_s3 = inlined_call_operand.vmem [shape: f32[8,1], index: 3, kind: output, shape index: {1}]  }
   0x1   :  { %v22_v0 = vld [vmem:[%s169_s0] sm:$0xff]  ;;  %v23_v1 = vld [vmem:[%s169_s0 + $0x8] sm:$0xff]  ;;  %20 = vst.msk [vmem:[#allocation3] sm:$0xff] %vm17_vm0, %v115_v3  ;;  %19 = vst.msk [vmem:[#allocation2] sm:$0xff] %vm17_vm0, %v115_v3 }
   0x2   :  { %v24_v2 = vld [vmem:[%s170_s1] sm:$0xff]  ;;  %21 = vst.msk [vmem:[#allocation4] sm:$0xff] %vm17_vm0, %v115_v3  ;;  %v25_v4 = vld [vmem:[%s170_s1 + $0x8] sm:$0xff]  ;;  %vm26_vm1 = vcmp.ge.f32.partialorder %v22_v0, 0.0  ;;  %vm27_vm2 = vcmp.ge.f32.partialorder %v23_v1, 0.0  ;;  %18 = vst.msk [vmem:[%s171_s2] sm:$0xff] %vm17_vm0, %v115_v3 }
   0x3   :  { %v105_v5 = vsel %vm26_vm1, 1.0, %v115_v3  ;;  %v106_v6 = vsel %vm27_vm2, 1.0, %v115_v3 }
   0x4   :  { %v32_v7 = vmul.f32 %v105_v5, %v24_v2  ;;  %v33_v8 = vmul.f32 %v106_v6, %v25_v4  ;;  %v34_v9 = vmul.f32 %v105_v5, %v22_v0  ;;  %v35_v10 = vmul.f32 %v106_v6, %v23_v1 }
   0x6   :  { %v54_v11 = vmul.f32 %v32_v7, %v32_v7  ;;  %v55_v12 = vmul.f32 %v33_v8, %v33_v8  ;;  %v62_v13 = vmul.f32 %v34_v9, %v34_v9  ;;  %v63_v14 = vmul.f32 %v35_v10, %v35_v10 }
   0x7   :  { %v46_v15 = vmul.f32 %v34_v9, %v32_v7  ;;  %v47_v16 = vmul.f32 %v35_v10, %v33_v8  ;;  %v37_v17 = vand.u32 2147483647, %v32_v7  ;;  %v38_v18 = vand.u32 2147483647, %v33_v8 }
   0x8   :  { %v56_v19 = vadd.f32 %v55_v12, %v54_v11  ;;  %v64_v21 = vadd.f32 %v63_v14, %v62_v13  ;;  %v53_v23 = vld [vmem:[#allocation3] sm:$0xff]  ;;  %v45_v24 = vld [vmem:[#allocation2] sm:$0xff] }
   0x9   :  { %v48_v20 = vadd.f32 %v47_v16, %v46_v15  ;;  %v39_v22 = vadd.f32 %v38_v18, %v37_v17  ;;  %v61_v28 = vld [vmem:[#allocation4] sm:$0xff]  ;;  %v36_v30 = vld [vmem:[%s171_s2] sm:$0xff] }
   0xa   :  { %57 = vadd.xlane.f32.xlu0 %v56_v19 }
   0xb   :  { %49 = vadd.xlane.f32.xlu1 %v48_v20 }
   0xe   :  { %65 = vadd.xlane.f32.xlu0 %v64_v21 }
   0xf   :  { %40 = vadd.xlane.f32.xlu1 %v39_v22 }
  0x97   :  { %v58_v25 = vpop.xlane.xlu0 %57 }
  0x98   :  { %v59_v26 = vadd.f32 %v58_v25, %v53_v23  ;;  %v50_v27 = vpop.xlane.xlu1 %49 }
  0x99   :  { %v51_v29 = vadd.f32 %v50_v27, %v45_v24 }
  0x9a   :  { %60 = vst.msk [vmem:[#allocation3] sm:$0xff] %vm17_vm0, %v59_v26 }
  0x9b   :  { %v66_v31 = vpop.xlane.xlu0 %65  ;;  %52 = vst.msk [vmem:[#allocation2] sm:$0xff] %vm17_vm0, %v51_v29 }
  0x9c   :  { %v67_v32 = vadd.f32 %v66_v31, %v61_v28  ;;  %v41_v33 = vpop.xlane.xlu1 %40 }
  0x9d   :  { %v42_v34 = vadd.f32 %v41_v33, %v36_v30 }
  0x9e   :  { %68 = vst.msk [vmem:[#allocation4] sm:$0xff] %vm17_vm0, %v67_v32 }
  0x9f   :  { %44 = vst.msk [vmem:[%s171_s2] sm:$0xff] %vm17_vm0, %v42_v34 }
  0xa1   :  { %v72_v35 = vld [vmem:[#allocation3] sm:$0xff] }
  0xa2   :  { %109 = vrsqrt.f32 %v72_v35  ;;  %vm75_vm3 = vcmp.eq.f32.partialorder %v72_v35, inf  ;;  %v78_v41 = vand.u32 2147483648, %v72_v35  ;;  %vm77_vm4 = vcmp.eq.f32.partialorder %v72_v35, 0.0  ;;  %v90_v50 = vld [vmem:[#allocation2] sm:$0xff] }
  0xa5   :  { %v81_v36 = vld [vmem:[#allocation4] sm:$0xff] }
  0xa6   :  { %111 = vrsqrt.f32 %v81_v36  ;;  %vm84_vm5 = vcmp.eq.f32.partialorder %v81_v36, inf  ;;  %v87_v44 = vand.u32 2147483648, %v81_v36  ;;  %vm86_vm6 = vcmp.eq.f32.partialorder %v81_v36, 0.0 }
  0xac   :  { %v110_v37 = vpop.eup %109 }
  0xad   :  { %v74_v38 = vmul.f32 %v110_v37, %v72_v35 }
  0xaf   :  { %v76_v39 = vsel %vm75_vm3, %v72_v35, %v74_v38 }
  0xb0   :  { %v112_v40 = vpop.eup %111  ;;  %v79_v43 = vsel %vm77_vm4, %v78_v41, %v76_v39 }
  0xb1   :  { %v83_v42 = vmul.f32 %v112_v40, %v81_v36  ;;  %v80_v47 = vmax.f32 %v79_v43, 1e-12 }
  0xb3   :  { %v85_v45 = vsel %vm84_vm5, %v81_v36, %v83_v42 }
  0xb4   :  { %v88_v46 = vsel %vm86_vm6, %v87_v44, %v85_v45 }
  0xb5   :  { %v89_v48 = vmax.f32 %v88_v46, 1e-12 }
  0xb7   :  { %v91_v49 = vmul.f32 %v89_v48, %v80_v47 }
  0xb9   :  { %113 = vrcp.f32 %v91_v49 }
  0xc3   :  { %v114_v51 = vpop.eup %113 }
  0xc4   :  { %v93_v52 = vmul.f32 %v114_v51, %v90_v50 }
  0xc6   :  { %v107_v53 = vclamps-f32 %v93_v52, 1.0 }
  0xc8   :  { %96 = vst.msk [vmem:[%s172_s3] sm:$0xff] %vm17_vm0, %v107_v53 }

</bundles_post_ra>
